<compile_context>
chip_gen: v6e
topology: v6e:2x2x1
jax: 0.10.0
libtpu: 0.0.40
codegen_flags: <defaults>
</compile_context>

<pallas_src>
import functools

import jax
import jax.numpy as jnp
import numpy as np
from jax.experimental import pallas as pl
from jax.experimental.pallas import tpu as pltpu

N2_PAD = 128          # DTW column axis padded to one full lane tile
EPS = 1e-8
BIG = 1e30            # "infinity" that stays finite under adds in f32


def dtw_kernel(t1_ref, t2_ref, out_ref, *, n1, n2):
    # ---- cosine cost matrix (single MXU matmul) ---------------------------
    t1 = t1_ref[...]                                   # (n1, d)
    t2 = t2_ref[...]                                   # (N2_PAD, d), zero-padded rows
    t1n = t1 * jax.lax.rsqrt(jnp.sum(t1 * t1, axis=-1, keepdims=True) + EPS)
    t2n = t2 * jax.lax.rsqrt(jnp.sum(t2 * t2, axis=-1, keepdims=True) + EPS)
    sim = jax.lax.dot_general(t1n, t2n, (((1,), (1,)), ((), ())),
                              preferred_element_type=jnp.float32)
    # Keep the cost matrix as a value (n1 is small: (n1,128) f32 is ~1 vreg
    # per 8 rows), so each DP row is a static sublane slice -- no VMEM
    # scratch round trip per row.
    cost = 1.0 - sim                                   # (n1, N2_PAD)
    # TODO(synk): for large n1, compute one cost row per DP step (or tile n1
    # via an "arbitrary" grid axis) instead of materializing (n1, 128) here.

    lane = jax.lax.broadcasted_iota(jnp.int32, (1, N2_PAD), 1)

    # Scan only deep enough to cover the n2 valid columns: ceil(log2(n2))
    # stages.  Columns j >= n2 become garbage but are never read.
    strides = []
    s = 1
    while s < pl.next_power_of_2(n2):
        strides.append(s)
        s *= 2

    # Hoist the shift masks off the per-row serial critical path.
    masks = {k: lane < k for k in set(strides) | {1}}

    def shift_right(x, k, fill):
        # output[j] = x[j - k] for j >= k, else `fill`   (x is (1, N2_PAD))
        return jnp.where(masks[k], fill, pltpu.roll(x, shift=k, axis=1))

    # ---- DTW dynamic program ---------------------------------------------
    # D[i,j] = c[i,j] + min(D[i-1,j], D[i,j-1], D[i-1,j-1])
    # Each row is a min-plus prefix scan:
    #   T_j(x) = min(pre[j], x + c[j]),  pre[j] = c[j] + min(Dp[j], Dp[j-1])
    #   compose((a1,b1),(a2,b2)) = (a1+a2, min(b2, b1+a2))
    dp = jnp.full((1, N2_PAD), BIG, dtype=jnp.float32)
    for i in range(n1):                                # n1 static -> fully unrolled
        c = cost[i:i + 1, :]                           # (1, N2_PAD) static slice
        diag_fill = 0.0 if i == 0 else BIG             # D[-1,-1] = 0 boundary
        dp_shift = shift_right(dp, 1, diag_fill)
        pre = c + jnp.minimum(dp, dp_shift)

        a, b = c, pre
        for k in strides:                              # ceil(log2(n2)) stages
            a_sh = shift_right(a, k, 0.0)
            b_sh = shift_right(b, k, BIG)
            b = jnp.minimum(b, b_sh + a)
            a = a_sh + a
        dp = b                                         # = D[i, :]

    # similarity = 1 / (1 + distance); wrapper picks out column n2-1.
    # EUP approximate reciprocal + one Newton step (epilogue, off crit path).
    x = 1.0 + dp
    r = pl.reciprocal(x, approx=True)
    out_ref[...] = r * (2.0 - x * r)


def dtw_similarity_batch(traj1, traj2):
    """Batched cosine-DTW similarity.

    traj1: (B, n1, d), traj2: (B, n2, d)  ->  (B,) similarities.
    Each grid step handles one pair; the grid axis is "parallel" so pairs are
    sharded across TensorCores on multi-core chips (v7x).
    """
    t1 = jnp.asarray(traj1, jnp.float32)
    t2 = jnp.asarray(traj2, jnp.float32)
    B, n1, d = t1.shape
    B2, n2, d2 = t2.shape
    assert B == B2 and d == d2, "batch / embedding dims must match"
    assert n2 <= N2_PAD, "trajectory2 length must fit in one lane tile"
    # TODO(synk): n2 > 128 would need a tiled / multi-block DP sweep.

    t2_pad = jnp.zeros((B, N2_PAD, d), jnp.float32).at[:, :n2, :].set(t2)

    kernel = functools.partial(dtw_kernel, n1=n1, n2=n2)
    out = pl.pallas_call(
        kernel,
        out_shape=jax.ShapeDtypeStruct((B, 1, N2_PAD), jnp.float32),
        grid=(B,),
        in_specs=[pl.BlockSpec((pl.Squeezed(), n1, d), lambda b: (b, 0, 0)),
                  pl.BlockSpec((pl.Squeezed(), N2_PAD, d), lambda b: (b, 0, 0))],
        out_specs=pl.BlockSpec((pl.Squeezed(), 1, N2_PAD), lambda b: (b, 0, 0)),
        compiler_params=pltpu.CompilerParams(
            dimension_semantics=("parallel",)),
    )(t1, t2_pad)
    return out[:, 0, n2 - 1]


def dtw_similarity(trajectory1, trajectory2):
    """Pallas equivalent of DTWCalculator.forward -> scalar similarity."""
    t1 = jnp.asarray(trajectory1, jnp.float32)
    t2 = jnp.asarray(trajectory2, jnp.float32)
    return dtw_similarity_batch(t1[None], t2[None])[0]


def _reference(t1, t2):
    """Pure numpy reference: cosine-cost DTW -> 1/(1+distance)."""
    a = np.asarray(t1, np.float64)
    b = np.asarray(t2, np.float64)
    an = a / np.sqrt((a * a).sum(-1, keepdims=True) + EPS)
    bn = b / np.sqrt((b * b).sum(-1, keepdims=True) + EPS)
    cost = 1.0 - an @ bn.T
    n1, n2 = cost.shape
    D = np.full((n1 + 1, n2 + 1), np.inf)
    D[0, 0] = 0.0
    for i in range(1, n1 + 1):
        for j in range(1, n2 + 1):
            D[i, j] = cost[i - 1, j - 1] + min(D[i - 1, j], D[i, j - 1],
                                               D[i - 1, j - 1])
    return 1.0 / (1.0 + D[n1, n2])


if __name__ == "__main__":
    n_layers, embedding_dim = 8, 32
    key = jax.random.PRNGKey(0)
    k1, k2 = jax.random.split(key)
    trajectory1 = jax.random.normal(k1, (n_layers, embedding_dim), jnp.float32)
    trajectory2 = jax.random.normal(k2, (n_layers, embedding_dim), jnp.float32)

    # single-pair forward (matches DTWCalculator.forward)
    sim = jax.block_until_ready(dtw_similarity(trajectory1, trajectory2))
    ref = _reference(trajectory1, trajectory2)
    np.testing.assert_allclose(np.asarray(sim), ref, rtol=1e-3, atol=1e-3)

    # batched path (parallel grid over pairs, like batch_compare's inner loop)
    B = 4
    kq, kd = jax.random.split(jax.random.PRNGKey(1))
    queries = jax.random.normal(kq, (B, n_layers, embedding_dim), jnp.float32)
    docs = jax.random.normal(kd, (B, n_layers, embedding_dim), jnp.float32)
    sims = jax.block_until_ready(dtw_similarity_batch(queries, docs))
    refs = np.array([_reference(queries[b], docs[b]) for b in range(B)])
    np.testing.assert_allclose(np.asarray(sims), refs, rtol=1e-3, atol=1e-3)

    print("KERNEL_OK")
</pallas_src>

<mosaic_0001>
module attributes {stable_mosaic.version = 11 : i64} {
  func.func @dtw_kernel(%arg0: i32, %arg1: memref<1x8x32xf32, #tpu.memory_space<vmem>>, %arg2: memref<1x128x32xf32, #tpu.memory_space<vmem>>, %arg3: memref<1x1x128xf32, #tpu.memory_space<vmem>>) attributes {dimension_semantics = [#tpu.dimension_semantics<parallel>], iteration_bounds = array<i64: 1>, scalar_prefetch = 0 : i64, scratch_operands = 0 : i64, tpu.core_type = #tpu.core_type<tc>, window_params = [{transform_indices = @transform_0, window_bounds = array<i64: 1, 8, 32>}, {transform_indices = @transform_1, window_bounds = array<i64: 1, 128, 32>}, {transform_indices = @transform_2, window_bounds = array<i64: 1, 1, 128>}]} {
    %c0 = arith.constant 0 : index
    %c0_0 = arith.constant 0 : index
    %c0_1 = arith.constant 0 : index
    %0 = vector.load %arg1[%c0, %c0_0, %c0_1] : memref<1x8x32xf32, #tpu.memory_space<vmem>>, vector<1x8x32xf32>
    %1 = vector.shape_cast %0 : vector<1x8x32xf32> to vector<8x32xf32>
    %c0_2 = arith.constant 0 : index
    %c0_3 = arith.constant 0 : index
    %c0_4 = arith.constant 0 : index
    %2 = vector.load %arg2[%c0_2, %c0_3, %c0_4] : memref<1x128x32xf32, #tpu.memory_space<vmem>>, vector<1x128x32xf32>
    %3 = vector.shape_cast %2 : vector<1x128x32xf32> to vector<128x32xf32>
    %4 = arith.mulf %1, %1 : vector<8x32xf32>
    %cst = arith.constant dense<0.000000e+00> : vector<8xf32>
    %5 = vector.multi_reduction <add>, %4, %cst [1] : vector<8x32xf32> to vector<8xf32>
    %6 = vector.shape_cast %5 : vector<8xf32> to vector<8x1xf32>
    %cst_5 = arith.constant 9.99999993E-9 : f32
    %7 = vector.broadcast %cst_5 : f32 to vector<8x1xf32>
    %8 = arith.addf %6, %7 : vector<8x1xf32>
    %9 = math.rsqrt %8 : vector<8x1xf32>
    %10 = vector.broadcast %9 : vector<8x1xf32> to vector<8x32xf32>
    %11 = arith.mulf %1, %10 : vector<8x32xf32>
    %12 = arith.mulf %3, %3 : vector<128x32xf32>
    %cst_6 = arith.constant dense<0.000000e+00> : vector<128xf32>
    %13 = vector.multi_reduction <add>, %12, %cst_6 [1] : vector<128x32xf32> to vector<128xf32>
    %14 = vector.shape_cast %13 : vector<128xf32> to vector<128x1xf32>
    %cst_7 = arith.constant 9.99999993E-9 : f32
    %15 = vector.broadcast %cst_7 : f32 to vector<128x1xf32>
    %16 = arith.addf %14, %15 : vector<128x1xf32>
    %17 = math.rsqrt %16 : vector<128x1xf32>
    %18 = vector.broadcast %17 : vector<128x1xf32> to vector<128x32xf32>
    %19 = arith.mulf %3, %18 : vector<128x32xf32>
    %cst_8 = arith.constant dense<0.000000e+00> : vector<8x128xf32>
    %20 = tpu.matmul %11, %19, %cst_8 {dimension_numbers = #tpu.dot_dimension_numbers<[1], [1], [0], [0], [0, 0, 1, 0], [], []>} : vector<8x32xf32>, vector<128x32xf32>, vector<8x128xf32> -> vector<8x128xf32>
    %cst_9 = arith.constant 1.000000e+00 : f32
    %21 = vector.broadcast %cst_9 : f32 to vector<8x128xf32>
    %22 = arith.subf %21, %20 : vector<8x128xf32>
    %23 = tpu.iota {dimensions = array<i32: 1>} : vector<1x128xi32>
    %c1_i32 = arith.constant 1 : i32
    %24 = vector.broadcast %c1_i32 : i32 to vector<1x128xi32>
    %25 = arith.cmpi slt, %23, %24 : vector<1x128xi32>
    %c2_i32 = arith.constant 2 : i32
    %26 = vector.broadcast %c2_i32 : i32 to vector<1x128xi32>
    %27 = arith.cmpi slt, %23, %26 : vector<1x128xi32>
    %c4_i32 = arith.constant 4 : i32
    %28 = vector.broadcast %c4_i32 : i32 to vector<1x128xi32>
    %29 = arith.cmpi slt, %23, %28 : vector<1x128xi32>
    %cst_10 = arith.constant 1.000000e+30 : f32
    %30 = vector.broadcast %cst_10 : f32 to vector<1x128xf32>
    %31 = vector.extract_strided_slice %22 {offsets = [0, 0], sizes = [1, 128], strides = [1, 1]} : vector<8x128xf32> to vector<1x128xf32>
    %c1_i32_11 = arith.constant 1 : i32
    %32 = tpu.dynamic_rotate %30 by %c1_i32_11 dim 1 : vector<1x128xf32>, i32 -> vector<1x128xf32>
    %cst_12 = arith.constant 0.000000e+00 : f32
    %33 = vector.broadcast %cst_12 : f32 to vector<1x128xf32>
    %34 = arith.select %25, %33, %32 : vector<1x128xi1>, vector<1x128xf32>
    %35 = arith.minimumf %30, %34 : vector<1x128xf32>
    %36 = arith.addf %31, %35 : vector<1x128xf32>
    %c1_i32_13 = arith.constant 1 : i32
    %37 = tpu.dynamic_rotate %31 by %c1_i32_13 dim 1 : vector<1x128xf32>, i32 -> vector<1x128xf32>
    %cst_14 = arith.constant 0.000000e+00 : f32
    %38 = vector.broadcast %cst_14 : f32 to vector<1x128xf32>
    %39 = arith.select %25, %38, %37 : vector<1x128xi1>, vector<1x128xf32>
    %c1_i32_15 = arith.constant 1 : i32
    %40 = tpu.dynamic_rotate %36 by %c1_i32_15 dim 1 : vector<1x128xf32>, i32 -> vector<1x128xf32>
    %cst_16 = arith.constant 1.000000e+30 : f32
    %41 = vector.broadcast %cst_16 : f32 to vector<1x128xf32>
    %42 = arith.select %25, %41, %40 : vector<1x128xi1>, vector<1x128xf32>
    %43 = arith.addf %42, %31 : vector<1x128xf32>
    %44 = arith.minimumf %36, %43 : vector<1x128xf32>
    %45 = arith.addf %39, %31 : vector<1x128xf32>
    %c2_i32_17 = arith.constant 2 : i32
    %46 = tpu.dynamic_rotate %45 by %c2_i32_17 dim 1 : vector<1x128xf32>, i32 -> vector<1x128xf32>
    %cst_18 = arith.constant 0.000000e+00 : f32
    %47 = vector.broadcast %cst_18 : f32 to vector<1x128xf32>
    %48 = arith.select %27, %47, %46 : vector<1x128xi1>, vector<1x128xf32>
    %c2_i32_19 = arith.constant 2 : i32
    %49 = tpu.dynamic_rotate %44 by %c2_i32_19 dim 1 : vector<1x128xf32>, i32 -> vector<1x128xf32>
    %cst_20 = arith.constant 1.000000e+30 : f32
    %50 = vector.broadcast %cst_20 : f32 to vector<1x128xf32>
    %51 = arith.select %27, %50, %49 : vector<1x128xi1>, vector<1x128xf32>
    %52 = arith.addf %51, %45 : vector<1x128xf32>
    %53 = arith.minimumf %44, %52 : vector<1x128xf32>
    %54 = arith.addf %48, %45 : vector<1x128xf32>
    %c4_i32_21 = arith.constant 4 : i32
    %55 = tpu.dynamic_rotate %53 by %c4_i32_21 dim 1 : vector<1x128xf32>, i32 -> vector<1x128xf32>
    %cst_22 = arith.constant 1.000000e+30 : f32
    %56 = vector.broadcast %cst_22 : f32 to vector<1x128xf32>
    %57 = arith.select %29, %56, %55 : vector<1x128xi1>, vector<1x128xf32>
    %58 = arith.addf %57, %54 : vector<1x128xf32>
    %59 = arith.minimumf %53, %58 : vector<1x128xf32>
    %60 = vector.extract_strided_slice %22 {offsets = [1, 0], sizes = [1, 128], strides = [1, 1]} : vector<8x128xf32> to vector<1x128xf32>
    %c1_i32_23 = arith.constant 1 : i32
    %61 = tpu.dynamic_rotate %59 by %c1_i32_23 dim 1 : vector<1x128xf32>, i32 -> vector<1x128xf32>
    %cst_24 = arith.constant 1.000000e+30 : f32
    %62 = vector.broadcast %cst_24 : f32 to vector<1x128xf32>
    %63 = arith.select %25, %62, %61 : vector<1x128xi1>, vector<1x128xf32>
    %64 = arith.minimumf %59, %63 : vector<1x128xf32>
    %65 = arith.addf %60, %64 : vector<1x128xf32>
    %c1_i32_25 = arith.constant 1 : i32
    %66 = tpu.dynamic_rotate %60 by %c1_i32_25 dim 1 : vector<1x128xf32>, i32 -> vector<1x128xf32>
    %cst_26 = arith.constant 0.000000e+00 : f32
    %67 = vector.broadcast %cst_26 : f32 to vector<1x128xf32>
    %68 = arith.select %25, %67, %66 : vector<1x128xi1>, vector<1x128xf32>
    %c1_i32_27 = arith.constant 1 : i32
    %69 = tpu.dynamic_rotate %65 by %c1_i32_27 dim 1 : vector<1x128xf32>, i32 -> vector<1x128xf32>
    %cst_28 = arith.constant 1.000000e+30 : f32
    %70 = vector.broadcast %cst_28 : f32 to vector<1x128xf32>
    %71 = arith.select %25, %70, %69 : vector<1x128xi1>, vector<1x128xf32>
    %72 = arith.addf %71, %60 : vector<1x128xf32>
    %73 = arith.minimumf %65, %72 : vector<1x128xf32>
    %74 = arith.addf %68, %60 : vector<1x128xf32>
    %c2_i32_29 = arith.constant 2 : i32
    %75 = tpu.dynamic_rotate %74 by %c2_i32_29 dim 1 : vector<1x128xf32>, i32 -> vector<1x128xf32>
    %cst_30 = arith.constant 0.000000e+00 : f32
    %76 = vector.broadcast %cst_30 : f32 to vector<1x128xf32>
    %77 = arith.select %27, %76, %75 : vector<1x128xi1>, vector<1x128xf32>
    %c2_i32_31 = arith.constant 2 : i32
    %78 = tpu.dynamic_rotate %73 by %c2_i32_31 dim 1 : vector<1x128xf32>, i32 -> vector<1x128xf32>
    %cst_32 = arith.constant 1.000000e+30 : f32
    %79 = vector.broadcast %cst_32 : f32 to vector<1x128xf32>
    %80 = arith.select %27, %79, %78 : vector<1x128xi1>, vector<1x128xf32>
    %81 = arith.addf %80, %74 : vector<1x128xf32>
    %82 = arith.minimumf %73, %81 : vector<1x128xf32>
    %83 = arith.addf %77, %74 : vector<1x128xf32>
    %c4_i32_33 = arith.constant 4 : i32
    %84 = tpu.dynamic_rotate %82 by %c4_i32_33 dim 1 : vector<1x128xf32>, i32 -> vector<1x128xf32>
    %cst_34 = arith.constant 1.000000e+30 : f32
    %85 = vector.broadcast %cst_34 : f32 to vector<1x128xf32>
    %86 = arith.select %29, %85, %84 : vector<1x128xi1>, vector<1x128xf32>
    %87 = arith.addf %86, %83 : vector<1x128xf32>
    %88 = arith.minimumf %82, %87 : vector<1x128xf32>
    %89 = vector.extract_strided_slice %22 {offsets = [2, 0], sizes = [1, 128], strides = [1, 1]} : vector<8x128xf32> to vector<1x128xf32>
    %c1_i32_35 = arith.constant 1 : i32
    %90 = tpu.dynamic_rotate %88 by %c1_i32_35 dim 1 : vector<1x128xf32>, i32 -> vector<1x128xf32>
    %cst_36 = arith.constant 1.000000e+30 : f32
    %91 = vector.broadcast %cst_36 : f32 to vector<1x128xf32>
    %92 = arith.select %25, %91, %90 : vector<1x128xi1>, vector<1x128xf32>
    %93 = arith.minimumf %88, %92 : vector<1x128xf32>
    %94 = arith.addf %89, %93 : vector<1x128xf32>
    %c1_i32_37 = arith.constant 1 : i32
    %95 = tpu.dynamic_rotate %89 by %c1_i32_37 dim 1 : vector<1x128xf32>, i32 -> vector<1x128xf32>
    %cst_38 = arith.constant 0.000000e+00 : f32
    %96 = vector.broadcast %cst_38 : f32 to vector<1x128xf32>
    %97 = arith.select %25, %96, %95 : vector<1x128xi1>, vector<1x128xf32>
    %c1_i32_39 = arith.constant 1 : i32
    %98 = tpu.dynamic_rotate %94 by %c1_i32_39 dim 1 : vector<1x128xf32>, i32 -> vector<1x128xf32>
    %cst_40 = arith.constant 1.000000e+30 : f32
    %99 = vector.broadcast %cst_40 : f32 to vector<1x128xf32>
    %100 = arith.select %25, %99, %98 : vector<1x128xi1>, vector<1x128xf32>
    %101 = arith.addf %100, %89 : vector<1x128xf32>
    %102 = arith.minimumf %94, %101 : vector<1x128xf32>
    %103 = arith.addf %97, %89 : vector<1x128xf32>
    %c2_i32_41 = arith.constant 2 : i32
    %104 = tpu.dynamic_rotate %103 by %c2_i32_41 dim 1 : vector<1x128xf32>, i32 -> vector<1x128xf32>
    %cst_42 = arith.constant 0.000000e+00 : f32
    %105 = vector.broadcast %cst_42 : f32 to vector<1x128xf32>
    %106 = arith.select %27, %105, %104 : vector<1x128xi1>, vector<1x128xf32>
    %c2_i32_43 = arith.constant 2 : i32
    %107 = tpu.dynamic_rotate %102 by %c2_i32_43 dim 1 : vector<1x128xf32>, i32 -> vector<1x128xf32>
    %cst_44 = arith.constant 1.000000e+30 : f32
    %108 = vector.broadcast %cst_44 : f32 to vector<1x128xf32>
    %109 = arith.select %27, %108, %107 : vector<1x128xi1>, vector<1x128xf32>
    %110 = arith.addf %109, %103 : vector<1x128xf32>
    %111 = arith.minimumf %102, %110 : vector<1x128xf32>
    %112 = arith.addf %106, %103 : vector<1x128xf32>
    %c4_i32_45 = arith.constant 4 : i32
    %113 = tpu.dynamic_rotate %111 by %c4_i32_45 dim 1 : vector<1x128xf32>, i32 -> vector<1x128xf32>
    %cst_46 = arith.constant 1.000000e+30 : f32
    %114 = vector.broadcast %cst_46 : f32 to vector<1x128xf32>
    %115 = arith.select %29, %114, %113 : vector<1x128xi1>, vector<1x128xf32>
    %116 = arith.addf %115, %112 : vector<1x128xf32>
    %117 = arith.minimumf %111, %116 : vector<1x128xf32>
    %118 = vector.extract_strided_slice %22 {offsets = [3, 0], sizes = [1, 128], strides = [1, 1]} : vector<8x128xf32> to vector<1x128xf32>
    %c1_i32_47 = arith.constant 1 : i32
    %119 = tpu.dynamic_rotate %117 by %c1_i32_47 dim 1 : vector<1x128xf32>, i32 -> vector<1x128xf32>
    %cst_48 = arith.constant 1.000000e+30 : f32
    %120 = vector.broadcast %cst_48 : f32 to vector<1x128xf32>
    %121 = arith.select %25, %120, %119 : vector<1x128xi1>, vector<1x128xf32>
    %122 = arith.minimumf %117, %121 : vector<1x128xf32>
    %123 = arith.addf %118, %122 : vector<1x128xf32>
    %c1_i32_49 = arith.constant 1 : i32
    %124 = tpu.dynamic_rotate %118 by %c1_i32_49 dim 1 : vector<1x128xf32>, i32 -> vector<1x128xf32>
    %cst_50 = arith.constant 0.000000e+00 : f32
    %125 = vector.broadcast %cst_50 : f32 to vector<1x128xf32>
    %126 = arith.select %25, %125, %124 : vector<1x128xi1>, vector<1x128xf32>
    %c1_i32_51 = arith.constant 1 : i32
    %127 = tpu.dynamic_rotate %123 by %c1_i32_51 dim 1 : vector<1x128xf32>, i32 -> vector<1x128xf32>
    %cst_52 = arith.constant 1.000000e+30 : f32
    %128 = vector.broadcast %cst_52 : f32 to vector<1x128xf32>
    %129 = arith.select %25, %128, %127 : vector<1x128xi1>, vector<1x128xf32>
    %130 = arith.addf %129, %118 : vector<1x128xf32>
    %131 = arith.minimumf %123, %130 : vector<1x128xf32>
    %132 = arith.addf %126, %118 : vector<1x128xf32>
    %c2_i32_53 = arith.constant 2 : i32
    %133 = tpu.dynamic_rotate %132 by %c2_i32_53 dim 1 : vector<1x128xf32>, i32 -> vector<1x128xf32>
    %cst_54 = arith.constant 0.000000e+00 : f32
    %134 = vector.broadcast %cst_54 : f32 to vector<1x128xf32>
    %135 = arith.select %27, %134, %133 : vector<1x128xi1>, vector<1x128xf32>
    %c2_i32_55 = arith.constant 2 : i32
    %136 = tpu.dynamic_rotate %131 by %c2_i32_55 dim 1 : vector<1x128xf32>, i32 -> vector<1x128xf32>
    %cst_56 = arith.constant 1.000000e+30 : f32
    %137 = vector.broadcast %cst_56 : f32 to vector<1x128xf32>
    %138 = arith.select %27, %137, %136 : vector<1x128xi1>, vector<1x128xf32>
    %139 = arith.addf %138, %132 : vector<1x128xf32>
    %140 = arith.minimumf %131, %139 : vector<1x128xf32>
    %141 = arith.addf %135, %132 : vector<1x128xf32>
    %c4_i32_57 = arith.constant 4 : i32
    %142 = tpu.dynamic_rotate %140 by %c4_i32_57 dim 1 : vector<1x128xf32>, i32 -> vector<1x128xf32>
    %cst_58 = arith.constant 1.000000e+30 : f32
    %143 = vector.broadcast %cst_58 : f32 to vector<1x128xf32>
    %144 = arith.select %29, %143, %142 : vector<1x128xi1>, vector<1x128xf32>
    %145 = arith.addf %144, %141 : vector<1x128xf32>
    %146 = arith.minimumf %140, %145 : vector<1x128xf32>
    %147 = vector.extract_strided_slice %22 {offsets = [4, 0], sizes = [1, 128], strides = [1, 1]} : vector<8x128xf32> to vector<1x128xf32>
    %c1_i32_59 = arith.constant 1 : i32
    %148 = tpu.dynamic_rotate %146 by %c1_i32_59 dim 1 : vector<1x128xf32>, i32 -> vector<1x128xf32>
    %cst_60 = arith.constant 1.000000e+30 : f32
    %149 = vector.broadcast %cst_60 : f32 to vector<1x128xf32>
    %150 = arith.select %25, %149, %148 : vector<1x128xi1>, vector<1x128xf32>
    %151 = arith.minimumf %146, %150 : vector<1x128xf32>
    %152 = arith.addf %147, %151 : vector<1x128xf32>
    %c1_i32_61 = arith.constant 1 : i32
    %153 = tpu.dynamic_rotate %147 by %c1_i32_61 dim 1 : vector<1x128xf32>, i32 -> vector<1x128xf32>
    %cst_62 = arith.constant 0.000000e+00 : f32
    %154 = vector.broadcast %cst_62 : f32 to vector<1x128xf32>
    %155 = arith.select %25, %154, %153 : vector<1x128xi1>, vector<1x128xf32>
    %c1_i32_63 = arith.constant 1 : i32
    %156 = tpu.dynamic_rotate %152 by %c1_i32_63 dim 1 : vector<1x128xf32>, i32 -> vector<1x128xf32>
    %cst_64 = arith.constant 1.000000e+30 : f32
    %157 = vector.broadcast %cst_64 : f32 to vector<1x128xf32>
    %158 = arith.select %25, %157, %156 : vector<1x128xi1>, vector<1x128xf32>
    %159 = arith.addf %158, %147 : vector<1x128xf32>
    %160 = arith.minimumf %152, %159 : vector<1x128xf32>
    %161 = arith.addf %155, %147 : vector<1x128xf32>
    %c2_i32_65 = arith.constant 2 : i32
    %162 = tpu.dynamic_rotate %161 by %c2_i32_65 dim 1 : vector<1x128xf32>, i32 -> vector<1x128xf32>
    %cst_66 = arith.constant 0.000000e+00 : f32
    %163 = vector.broadcast %cst_66 : f32 to vector<1x128xf32>
    %164 = arith.select %27, %163, %162 : vector<1x128xi1>, vector<1x128xf32>
    %c2_i32_67 = arith.constant 2 : i32
    %165 = tpu.dynamic_rotate %160 by %c2_i32_67 dim 1 : vector<1x128xf32>, i32 -> vector<1x128xf32>
    %cst_68 = arith.constant 1.000000e+30 : f32
    %166 = vector.broadcast %cst_68 : f32 to vector<1x128xf32>
    %167 = arith.select %27, %166, %165 : vector<1x128xi1>, vector<1x128xf32>
    %168 = arith.addf %167, %161 : vector<1x128xf32>
    %169 = arith.minimumf %160, %168 : vector<1x128xf32>
    %170 = arith.addf %164, %161 : vector<1x128xf32>
    %c4_i32_69 = arith.constant 4 : i32
    %171 = tpu.dynamic_rotate %169 by %c4_i32_69 dim 1 : vector<1x128xf32>, i32 -> vector<1x128xf32>
    %cst_70 = arith.constant 1.000000e+30 : f32
    %172 = vector.broadcast %cst_70 : f32 to vector<1x128xf32>
    %173 = arith.select %29, %172, %171 : vector<1x128xi1>, vector<1x128xf32>
    %174 = arith.addf %173, %170 : vector<1x128xf32>
    %175 = arith.minimumf %169, %174 : vector<1x128xf32>
    %176 = vector.extract_strided_slice %22 {offsets = [5, 0], sizes = [1, 128], strides = [1, 1]} : vector<8x128xf32> to vector<1x128xf32>
    %c1_i32_71 = arith.constant 1 : i32
    %177 = tpu.dynamic_rotate %175 by %c1_i32_71 dim 1 : vector<1x128xf32>, i32 -> vector<1x128xf32>
    %cst_72 = arith.constant 1.000000e+30 : f32
    %178 = vector.broadcast %cst_72 : f32 to vector<1x128xf32>
    %179 = arith.select %25, %178, %177 : vector<1x128xi1>, vector<1x128xf32>
    %180 = arith.minimumf %175, %179 : vector<1x128xf32>
    %181 = arith.addf %176, %180 : vector<1x128xf32>
    %c1_i32_73 = arith.constant 1 : i32
    %182 = tpu.dynamic_rotate %176 by %c1_i32_73 dim 1 : vector<1x128xf32>, i32 -> vector<1x128xf32>
    %cst_74 = arith.constant 0.000000e+00 : f32
    %183 = vector.broadcast %cst_74 : f32 to vector<1x128xf32>
    %184 = arith.select %25, %183, %182 : vector<1x128xi1>, vector<1x128xf32>
    %c1_i32_75 = arith.constant 1 : i32
    %185 = tpu.dynamic_rotate %181 by %c1_i32_75 dim 1 : vector<1x128xf32>, i32 -> vector<1x128xf32>
    %cst_76 = arith.constant 1.000000e+30 : f32
    %186 = vector.broadcast %cst_76 : f32 to vector<1x128xf32>
    %187 = arith.select %25, %186, %185 : vector<1x128xi1>, vector<1x128xf32>
    %188 = arith.addf %187, %176 : vector<1x128xf32>
    %189 = arith.minimumf %181, %188 : vector<1x128xf32>
    %190 = arith.addf %184, %176 : vector<1x128xf32>
    %c2_i32_77 = arith.constant 2 : i32
    %191 = tpu.dynamic_rotate %190 by %c2_i32_77 dim 1 : vector<1x128xf32>, i32 -> vector<1x128xf32>
    %cst_78 = arith.constant 0.000000e+00 : f32
    %192 = vector.broadcast %cst_78 : f32 to vector<1x128xf32>
    %193 = arith.select %27, %192, %191 : vector<1x128xi1>, vector<1x128xf32>
    %c2_i32_79 = arith.constant 2 : i32
    %194 = tpu.dynamic_rotate %189 by %c2_i32_79 dim 1 : vector<1x128xf32>, i32 -> vector<1x128xf32>
    %cst_80 = arith.constant 1.000000e+30 : f32
    %195 = vector.broadcast %cst_80 : f32 to vector<1x128xf32>
    %196 = arith.select %27, %195, %194 : vector<1x128xi1>, vector<1x128xf32>
    %197 = arith.addf %196, %190 : vector<1x128xf32>
    %198 = arith.minimumf %189, %197 : vector<1x128xf32>
    %199 = arith.addf %193, %190 : vector<1x128xf32>
    %c4_i32_81 = arith.constant 4 : i32
    %200 = tpu.dynamic_rotate %198 by %c4_i32_81 dim 1 : vector<1x128xf32>, i32 -> vector<1x128xf32>
    %cst_82 = arith.constant 1.000000e+30 : f32
    %201 = vector.broadcast %cst_82 : f32 to vector<1x128xf32>
    %202 = arith.select %29, %201, %200 : vector<1x128xi1>, vector<1x128xf32>
    %203 = arith.addf %202, %199 : vector<1x128xf32>
    %204 = arith.minimumf %198, %203 : vector<1x128xf32>
    %205 = vector.extract_strided_slice %22 {offsets = [6, 0], sizes = [1, 128], strides = [1, 1]} : vector<8x128xf32> to vector<1x128xf32>
    %c1_i32_83 = arith.constant 1 : i32
    %206 = tpu.dynamic_rotate %204 by %c1_i32_83 dim 1 : vector<1x128xf32>, i32 -> vector<1x128xf32>
    %cst_84 = arith.constant 1.000000e+30 : f32
    %207 = vector.broadcast %cst_84 : f32 to vector<1x128xf32>
    %208 = arith.select %25, %207, %206 : vector<1x128xi1>, vector<1x128xf32>
    %209 = arith.minimumf %204, %208 : vector<1x128xf32>
    %210 = arith.addf %205, %209 : vector<1x128xf32>
    %c1_i32_85 = arith.constant 1 : i32
    %211 = tpu.dynamic_rotate %205 by %c1_i32_85 dim 1 : vector<1x128xf32>, i32 -> vector<1x128xf32>
    %cst_86 = arith.constant 0.000000e+00 : f32
    %212 = vector.broadcast %cst_86 : f32 to vector<1x128xf32>
    %213 = arith.select %25, %212, %211 : vector<1x128xi1>, vector<1x128xf32>
    %c1_i32_87 = arith.constant 1 : i32
    %214 = tpu.dynamic_rotate %210 by %c1_i32_87 dim 1 : vector<1x128xf32>, i32 -> vector<1x128xf32>
    %cst_88 = arith.constant 1.000000e+30 : f32
    %215 = vector.broadcast %cst_88 : f32 to vector<1x128xf32>
    %216 = arith.select %25, %215, %214 : vector<1x128xi1>, vector<1x128xf32>
    %217 = arith.addf %216, %205 : vector<1x128xf32>
    %218 = arith.minimumf %210, %217 : vector<1x128xf32>
    %219 = arith.addf %213, %205 : vector<1x128xf32>
    %c2_i32_89 = arith.constant 2 : i32
    %220 = tpu.dynamic_rotate %219 by %c2_i32_89 dim 1 : vector<1x128xf32>, i32 -> vector<1x128xf32>
    %cst_90 = arith.constant 0.000000e+00 : f32
    %221 = vector.broadcast %cst_90 : f32 to vector<1x128xf32>
    %222 = arith.select %27, %221, %220 : vector<1x128xi1>, vector<1x128xf32>
    %c2_i32_91 = arith.constant 2 : i32
    %223 = tpu.dynamic_rotate %218 by %c2_i32_91 dim 1 : vector<1x128xf32>, i32 -> vector<1x128xf32>
    %cst_92 = arith.constant 1.000000e+30 : f32
    %224 = vector.broadcast %cst_92 : f32 to vector<1x128xf32>
    %225 = arith.select %27, %224, %223 : vector<1x128xi1>, vector<1x128xf32>
    %226 = arith.addf %225, %219 : vector<1x128xf32>
    %227 = arith.minimumf %218, %226 : vector<1x128xf32>
    %228 = arith.addf %222, %219 : vector<1x128xf32>
    %c4_i32_93 = arith.constant 4 : i32
    %229 = tpu.dynamic_rotate %227 by %c4_i32_93 dim 1 : vector<1x128xf32>, i32 -> vector<1x128xf32>
    %cst_94 = arith.constant 1.000000e+30 : f32
    %230 = vector.broadcast %cst_94 : f32 to vector<1x128xf32>
    %231 = arith.select %29, %230, %229 : vector<1x128xi1>, vector<1x128xf32>
    %232 = arith.addf %231, %228 : vector<1x128xf32>
    %233 = arith.minimumf %227, %232 : vector<1x128xf32>
    %234 = vector.extract_strided_slice %22 {offsets = [7, 0], sizes = [1, 128], strides = [1, 1]} : vector<8x128xf32> to vector<1x128xf32>
    %c1_i32_95 = arith.constant 1 : i32
    %235 = tpu.dynamic_rotate %233 by %c1_i32_95 dim 1 : vector<1x128xf32>, i32 -> vector<1x128xf32>
    %cst_96 = arith.constant 1.000000e+30 : f32
    %236 = vector.broadcast %cst_96 : f32 to vector<1x128xf32>
    %237 = arith.select %25, %236, %235 : vector<1x128xi1>, vector<1x128xf32>
    %238 = arith.minimumf %233, %237 : vector<1x128xf32>
    %239 = arith.addf %234, %238 : vector<1x128xf32>
    %c1_i32_97 = arith.constant 1 : i32
    %240 = tpu.dynamic_rotate %234 by %c1_i32_97 dim 1 : vector<1x128xf32>, i32 -> vector<1x128xf32>
    %cst_98 = arith.constant 0.000000e+00 : f32
    %241 = vector.broadcast %cst_98 : f32 to vector<1x128xf32>
    %242 = arith.select %25, %241, %240 : vector<1x128xi1>, vector<1x128xf32>
    %c1_i32_99 = arith.constant 1 : i32
    %243 = tpu.dynamic_rotate %239 by %c1_i32_99 dim 1 : vector<1x128xf32>, i32 -> vector<1x128xf32>
    %cst_100 = arith.constant 1.000000e+30 : f32
    %244 = vector.broadcast %cst_100 : f32 to vector<1x128xf32>
    %245 = arith.select %25, %244, %243 : vector<1x128xi1>, vector<1x128xf32>
    %246 = arith.addf %245, %234 : vector<1x128xf32>
    %247 = arith.minimumf %239, %246 : vector<1x128xf32>
    %248 = arith.addf %242, %234 : vector<1x128xf32>
    %c2_i32_101 = arith.constant 2 : i32
    %249 = tpu.dynamic_rotate %248 by %c2_i32_101 dim 1 : vector<1x128xf32>, i32 -> vector<1x128xf32>
    %cst_102 = arith.constant 0.000000e+00 : f32
    %250 = vector.broadcast %cst_102 : f32 to vector<1x128xf32>
    %251 = arith.select %27, %250, %249 : vector<1x128xi1>, vector<1x128xf32>
    %c2_i32_103 = arith.constant 2 : i32
    %252 = tpu.dynamic_rotate %247 by %c2_i32_103 dim 1 : vector<1x128xf32>, i32 -> vector<1x128xf32>
    %cst_104 = arith.constant 1.000000e+30 : f32
    %253 = vector.broadcast %cst_104 : f32 to vector<1x128xf32>
    %254 = arith.select %27, %253, %252 : vector<1x128xi1>, vector<1x128xf32>
    %255 = arith.addf %254, %248 : vector<1x128xf32>
    %256 = arith.minimumf %247, %255 : vector<1x128xf32>
    %257 = arith.addf %251, %248 : vector<1x128xf32>
    %c4_i32_105 = arith.constant 4 : i32
    %258 = tpu.dynamic_rotate %256 by %c4_i32_105 dim 1 : vector<1x128xf32>, i32 -> vector<1x128xf32>
    %cst_106 = arith.constant 1.000000e+30 : f32
    %259 = vector.broadcast %cst_106 : f32 to vector<1x128xf32>
    %260 = arith.select %29, %259, %258 : vector<1x128xi1>, vector<1x128xf32>
    %261 = arith.addf %260, %257 : vector<1x128xf32>
    %262 = arith.minimumf %256, %261 : vector<1x128xf32>
    %cst_107 = arith.constant 1.000000e+00 : f32
    %263 = vector.broadcast %cst_107 : f32 to vector<1x128xf32>
    %264 = arith.addf %263, %262 : vector<1x128xf32>
    %265 = tpu.reciprocal %264 {approx = true} : vector<1x128xf32> -> vector<1x128xf32>
    %266 = arith.mulf %264, %265 : vector<1x128xf32>
    %cst_108 = arith.constant 2.000000e+00 : f32
    %267 = vector.broadcast %cst_108 : f32 to vector<1x128xf32>
    %268 = arith.subf %267, %266 : vector<1x128xf32>
    %269 = arith.mulf %265, %268 : vector<1x128xf32>
    %c0_109 = arith.constant 0 : index
    %c0_110 = arith.constant 0 : index
    %c0_111 = arith.constant 0 : index
    %270 = vector.load %arg3[%c0_109, %c0_110, %c0_111] : memref<1x1x128xf32, #tpu.memory_space<vmem>>, vector<1x1x128xf32>
    %271 = vector.shape_cast %270 : vector<1x1x128xf32> to vector<1x128xf32>
    %272 = vector.shape_cast %269 : vector<1x128xf32> to vector<1x1x128xf32>
    tpu.vector_store %arg3[%c0_109, %c0_110, %c0_111], %272 {strides = array<i32>} : memref<1x1x128xf32, #tpu.memory_space<vmem>>, vector<1x1x128xf32>,
    return
  }
  func.func @transform_0(%arg0: i32) -> (i32, i32, i32) {
    %c0_i32 = arith.constant 0 : i32
    %c0_i32_0 = arith.constant 0 : i32
    %c0_i32_1 = arith.constant 0 : i32
    return %arg0, %c0_i32, %c0_i32_0 : i32, i32, i32
  }
  func.func @transform_1(%arg0: i32) -> (i32, i32, i32) {
    %c0_i32 = arith.constant 0 : i32
    %c0_i32_0 = arith.constant 0 : i32
    %c0_i32_1 = arith.constant 0 : i32
    return %arg0, %c0_i32, %c0_i32_0 : i32, i32, i32
  }
  func.func @transform_2(%arg0: i32) -> (i32, i32, i32) {
    %c0_i32 = arith.constant 0 : i32
    %c0_i32_0 = arith.constant 0 : i32
    %c0_i32_1 = arith.constant 0 : i32
    return %arg0, %c0_i32, %c0_i32_0 : i32, i32, i32
  }
}

</mosaic_0001>

<bundles_post_ra>
// kernel: tpu_custom_call.1
= control target key start
LH: loop header
LB: loop body
LE: loop exit
PB: predicated region body
PF: predicated region fallthrough
CT: control target
= control target key end

     0   :  { %vm30_vm0 = vcmask 261120   ;;  %s1233_s0 = inlined_call_operand.vmem [shape: f32[1,8,32], index: 0, kind: input, shape index: {}]   ;;  %s1234_s1 = inlined_call_operand.vmem [shape: f32[1,128,32], index: 1, kind: input, shape index: {}]   ;;  %s1235_s2 = inlined_call_operand.hbm [shape: f32[1,1,128], index: 2, kind: output, shape index: {}]  }
   0x1   :  { %v877_v0 = vld [vmem:[%s1234_s1 + $0x78] sm:$0xff]  ;;  %v882_v1 = vld [vmem:[%s1234_s1 + $0x70] sm:$0xff]  ;;  %v887_v2 = vld [vmem:[%s1234_s1 + $0x68] sm:$0xff] }
   0x2   :  { %v52_v3 = vmul.f32 %v877_v0, %v877_v0  ;;  %v51_v4 = vmul.f32 %v882_v1, %v882_v1  ;;  %v50_v5 = vmul.f32 %v887_v2, %v887_v2  ;;  %v898_v6 = vld [vmem:[%s1234_s1 + $0x60] sm:$0xff]  ;;  %v905_v8 = vld [vmem:[%s1234_s1 + $0x58] sm:$0xff]  ;;  %v910_v9 = vld [vmem:[%s1234_s1 + $0x50] sm:$0xff] }
   0x3   :  { %v49_v7 = vmul.f32 %v898_v6, %v898_v6  ;;  %v48_v14 = vmul.f32 %v905_v8, %v905_v8  ;;  %v47_v15 = vmul.f32 %v910_v9, %v910_v9 }
   0x4   :  { %v98_v10 = vsel %vm30_vm0, %v52_v3, 0.0  ;;  %v92_v11 = vsel %vm30_vm0, %v50_v5, 0.0  ;;  %v95_v12 = vsel %vm30_vm0, %v51_v4, 0.0 }
   0x5   :  { %99 = vadd.xlane.f32.xlu0 %v98_v10  ;;  %93 = vadd.xlane.f32.xlu1 %v92_v11  ;;  %v89_v13 = vsel %vm30_vm0, %v49_v7, 0.0 }
   0x6   :  { %7 = vsyncpa [#allocation3], 0  ;;  %v923_v16 = vld [vmem:[%s1234_s1 + $0x48] sm:$0xff]  ;;  %v928_v17 = vld [vmem:[%s1234_s1 + $0x40] sm:$0xff]  ;;  %v86_v18 = vsel %vm30_vm0, %v48_v14, 0.0  ;;  %v83_v19 = vsel %vm30_vm0, %v47_v15, 0.0 }
   0x7   :  { %v46_v20 = vmul.f32 %v923_v16, %v923_v16  ;;  %v45_v21 = vmul.f32 %v928_v17, %v928_v17  ;;  %v939_v22 = vld [vmem:[%s1234_s1 + $0x38] sm:$0xff]  ;;  %v944_v23 = vld [vmem:[%s1234_s1 + $0x30] sm:$0xff]  ;;  %v955_v28 = vld [vmem:[%s1234_s1 + $0x28] sm:$0xff]  ;;  %v852_v46 = vmov 0.0   ;;  %vm853_vm1 = vmmov 0   ;;  %s857_s15 = smov 4  }
   0x8   :  { %v44_v26 = vmul.f32 %v939_v22, %v939_v22  ;;  %v43_v27 = vmul.f32 %v944_v23, %v944_v23  ;;  %v960_v29 = vld [vmem:[%s1234_s1 + $0x20] sm:$0xff]  ;;  %v42_v32 = vmul.f32 %v955_v28, %v955_v28  ;;  %v971_v34 = vld [vmem:[%s1234_s1 + $0x18] sm:$0xff]  ;;  %v976_v35 = vld [vmem:[%s1234_s1 + $0x10] sm:$0xff]  ;;  %752 = vmatprep.subr.mxu0 %v852_v46  ;;  %784 = vmatprep.mubr.msk.f32.mxu0 %vm853_vm1, %v852_v46  ;;  %v854_v52 = vmov 1e+30   ;;  %s858_s16 = smov [#allocation2]  }
   0x9   :  { %96 = vadd.xlane.f32.xlu0 %v95_v12  ;;  %90 = vadd.xlane.f32.xlu1 %v89_v13  ;;  %v80_v24 = vsel %vm30_vm0, %v46_v20, 0.0  ;;  %v77_v25 = vsel %vm30_vm0, %v45_v21, 0.0  ;;  %v41_v33 = vmul.f32 %v960_v29, %v960_v29  ;;  %v40_v38 = vmul.f32 %v971_v34, %v971_v34  ;;  %v987_v40 = vld [vmem:[%s1234_s1 + $0x8] sm:$0xff]  ;;  %v992_v41 = vld [vmem:[%s1234_s1] sm:$0xff]  ;;  %s856_s1 = smov 2   ;;  %s710_s17 = sshll.u32 %s858_s16, 4  ;;  %s711_s17 = int_to_ptr.vmem [resolvable:$true] %s710_s17 }
   0xa   :  { %v74_v30 = vsel %vm30_vm0, %v44_v26, 0.0  ;;  %v71_v31 = vsel %vm30_vm0, %v43_v27, 0.0  ;;  %v68_v36 = vsel %vm30_vm0, %v42_v32, 0.0  ;;  %v39_v39 = vmul.f32 %v976_v35, %v976_v35  ;;  %v1004_v47 = vld [vmem:[%s1233_s0] sm:$0xff]  ;;  %s855_s0 = smov 1   ;;  %s830_s18 = scalar_lea.vmem %s711_s17, 16 }
   0xb   :  { %v65_v37 = vsel %vm30_vm0, %v41_v33, 0.0  ;;  %v62_v42 = vsel %vm30_vm0, %v40_v38, 0.0  ;;  %v38_v44 = vmul.f32 %v987_v40, %v987_v40  ;;  %v37_v45 = vmul.f32 %v992_v41, %v992_v41  ;;  %p831_p0 = scmp.ne.s32.totalorder %s711_s17, %s830_s18  ;;  %s834_s19 = scalar_lea.vmem %s711_s17, 32 }
   0xc   :  { %v59_v43 = vsel %vm30_vm0, %v39_v39, 0.0  ;;  %v29_v50 = vmul.f32 %v1004_v47, %v1004_v47  ;;  %p835_p1 = scmp.lt.s32.totalorder %s711_s17, %s711_s17  ;;  %p836_p2 = scmp.lt.s32.totalorder %s834_s19, %s830_s18 }
   0xd   :  { %87 = vadd.xlane.f32.xlu0 %v86_v18  ;;  %84 = vadd.xlane.f32.xlu1 %v83_v19  ;;  %v56_v48 = vsel %vm30_vm0, %v38_v44, 0.0  ;;  %v53_v49 = vsel %vm30_vm0, %v37_v45, 0.0 }
   0xe   :  { %v31_v51 = vsel %vm30_vm0, %v29_v50, 0.0  ;;  %p837_p3 = por %p836_p2, %p835_p1 }
  0x10   :  { %p838_p4 = pnand %p837_p3, %p831_p0 }
  0x11   :  { %81 = vadd.xlane.f32.xlu0 %v80_v24  ;;  %78 = vadd.xlane.f32.xlu1 %v77_v25 }
  0x15   :  { %75 = vadd.xlane.f32.xlu0 %v74_v30  ;;  %72 = vadd.xlane.f32.xlu1 %v71_v31 }
  0x19   :  { %69 = vadd.xlane.f32.xlu0 %v68_v36  ;;  %66 = vadd.xlane.f32.xlu1 %v65_v37 }
  0x1d   :  { %63 = vadd.xlane.f32.xlu0 %v62_v42  ;;  %60 = vadd.xlane.f32.xlu1 %v59_v43 }
  0x21   :  { %57 = vadd.xlane.f32.xlu0 %v56_v48  ;;  %54 = vadd.xlane.f32.xlu1 %v53_v49 }
  0x25   :  { %32 = vadd.xlane.f32.xlu0 %v31_v51 }
  0x32   :  { %276 = vrot.lane.b32.xlu1 %v854_v52, %s855_s0 }
  0x8e   :  { %v100_v53 = vpop.xlane.xlu0 %99  ;;  %v94_v54 = vpop.xlane.xlu1 %93 }
  0x8f   :  { %v116_v55 = vadd.f32 1e-08, %v100_v53  ;;  %v114_v56 = vadd.f32 1e-08, %v94_v54 }
  0x91   :  { %794 = vrsqrt.f32 %v116_v55 }
  0x92   :  { %v97_v57 = vpop.xlane.xlu0 %96  ;;  %v91_v58 = vpop.xlane.xlu1 %90  ;;  %796 = vrsqrt.f32 %v114_v56 }
  0x93   :  { %v115_v59 = vadd.f32 1e-08, %v97_v57  ;;  %v113_v60 = vadd.f32 1e-08, %v91_v58 }
  0x95   :  { %798 = vrsqrt.f32 %v115_v59 }
  0x96   :  { %v88_v61 = vpop.xlane.xlu0 %87  ;;  %800 = vrsqrt.f32 %v113_v60  ;;  %v85_v63 = vpop.xlane.xlu1 %84 }
  0x97   :  { %v112_v62 = vadd.f32 1e-08, %v88_v61  ;;  %v111_v3 = vadd.f32 1e-08, %v85_v63 }
  0x99   :  { %802 = vrsqrt.f32 %v112_v62 }
  0x9a   :  { %v82_v5 = vpop.xlane.xlu0 %81  ;;  %804 = vrsqrt.f32 %v111_v3  ;;  %v79_v13 = vpop.xlane.xlu1 %78 }
  0x9b   :  { %v110_v11 = vadd.f32 1e-08, %v82_v5  ;;  %v109_v18 = vadd.f32 1e-08, %v79_v13 }
  0x9d   :  { %806 = vrsqrt.f32 %v110_v11 }
  0x9e   :  { %v795_v4 = vpop.eup %794  ;;  %808 = vrsqrt.f32 %v109_v18 }
  0x9f   :  { %v148_v7 = vmul.f32 %v795_v4, %v877_v0  ;;  %v797_v10 = vpop.eup %796  ;;  %v76_v0 = vpop.xlane.xlu0 %75 }
  0xa0   :  { %v146_v15 = vmul.f32 %v797_v10, %v887_v2  ;;  %v108_v21 = vadd.f32 1e-08, %v76_v0 }
  0xa1   :  { %753 = vmatpush3.xpose.msk.msra.mxu0 %vm30_vm0, %v148_v7 }
  0xa2   :  { %v799_v12 = vpop.eup %798  ;;  %754 = vmatprep.subr.mxu0 %v852_v46  ;;  %810 = vrsqrt.f32 %v108_v21 }
  0xa3   :  { %v147_v14 = vmul.f32 %v799_v12, %v882_v1  ;;  %v801_v19 = vpop.eup %800  ;;  %v73_v1 = vpop.xlane.xlu1 %72 }
  0xa4   :  { %v145_v20 = vmul.f32 %v801_v19, %v898_v6  ;;  %v107_v25 = vadd.f32 1e-08, %v73_v1  ;;  %v70_v27 = vpop.xlane.xlu0 %69 }
  0xa5   :  { %755 = vmatpush3.xpose.msk.msra.mxu0 %vm30_vm0, %v147_v14  ;;  %v106_v30 = vadd.f32 1e-08, %v70_v27 }
  0xa6   :  { %756 = vmatprep.subr.mxu0 %v852_v46  ;;  %v803_v24 = vpop.eup %802  ;;  %812 = vrsqrt.f32 %v107_v25 }
  0xa7   :  { %v144_v2 = vmul.f32 %v803_v24, %v905_v8  ;;  %v805_v26 = vpop.eup %804  ;;  %v67_v32 = vpop.xlane.xlu1 %66  ;;  %814 = vrsqrt.f32 %v106_v30 }
  0xa8   :  { %v143_v6 = vmul.f32 %v805_v26, %v910_v9  ;;  %v105_v33 = vadd.f32 1e-08, %v67_v32  ;;  %v64_v37 = vpop.xlane.xlu0 %63 }
  0xa9   :  { %757 = vmatpush3.xpose.msk.msra.mxu0 %vm30_vm0, %v146_v15  ;;  %v104_v38 = vadd.f32 1e-08, %v64_v37 }
  0xaa   :  { %758 = vmatprep.subr.mxu0 %v852_v46  ;;  %v807_v31 = vpop.eup %806  ;;  %816 = vrsqrt.f32 %v105_v33 }
  0xab   :  { %v142_v8 = vmul.f32 %v807_v31, %v923_v16  ;;  %v809_v36 = vpop.eup %808  ;;  %v61_v42 = vpop.xlane.xlu1 %60  ;;  %818 = vrsqrt.f32 %v104_v38 }
  0xac   :  { %v141_v9 = vmul.f32 %v809_v36, %v928_v17  ;;  %v103_v43 = vadd.f32 1e-08, %v61_v42  ;;  %v58_v45 = vpop.xlane.xlu0 %57 }
  0xad   :  { %759 = vmatpush3.xpose.msk.msra.mxu0 %vm30_vm0, %v145_v20  ;;  %v102_v48 = vadd.f32 1e-08, %v58_v45 }
  0xae   :  { %760 = vmatprep.subr.mxu0 %v852_v46  ;;  %820 = vrsqrt.f32 %v103_v43 }
  0xaf   :  { %v811_v39 = vpop.eup %810  ;;  %v55_v50 = vpop.xlane.xlu1 %54  ;;  %822 = vrsqrt.f32 %v102_v48 }
  0xb0   :  { %v140_v16 = vmul.f32 %v811_v39, %v939_v22  ;;  %v101_v51 = vadd.f32 1e-08, %v55_v50  ;;  %v33_v52 = vpop.xlane.xlu0 %32 }
  0xb1   :  { %761 = vmatpush3.xpose.msk.msra.mxu0 %vm30_vm0, %v144_v2  ;;  %v34_v54 = vadd.f32 1e-08, %v33_v52 }
  0xb2   :  { %762 = vmatprep.subr.mxu0 %v852_v46  ;;  %824 = vrsqrt.f32 %v101_v51 }
  0xb3   :  { %v813_v44 = vpop.eup %812  ;;  %826 = vrsqrt.f32 %v34_v54 }
  0xb4   :  { %v139_v17 = vmul.f32 %v813_v44, %v944_v23  ;;  %v815_v49 = vpop.eup %814 }
  0xb5   :  { %763 = vmatpush3.xpose.msk.msra.mxu0 %vm30_vm0, %v143_v6  ;;  %v138_v22 = vmul.f32 %v815_v49, %v955_v28 }
  0xb6   :  { %764 = vmatprep.subr.mxu0 %v852_v46 }
  0xb7   :  { %v817_v53 = vpop.eup %816 }
  0xb8   :  { %v137_v23 = vmul.f32 %v817_v53, %v960_v29  ;;  %v819_v55 = vpop.eup %818 }
  0xb9   :  { %765 = vmatpush3.xpose.msk.msra.mxu0 %vm30_vm0, %v142_v8  ;;  %v136_v56 = vmul.f32 %v819_v55, %v971_v34 }
  0xba   :  { %766 = vmatprep.subr.mxu0 %v852_v46 }
  0xbb   :  { %v821_v28 = vpop.eup %820 }
  0xbc   :  { %v135_v57 = vmul.f32 %v821_v28, %v976_v35  ;;  %v823_v58 = vpop.eup %822  ;;  %v271_v35 = vlaneseq }
  0xbd   :  { %767 = vmatpush3.xpose.msk.msra.mxu0 %vm30_vm0, %v141_v9  ;;  %v134_v29 = vmul.f32 %v823_v58, %v987_v40  ;;  %v277_v40 = vpop.permute.xlu1 %276 }
  0xbe   :  { %768 = vmatprep.subr.mxu0 %v852_v46  ;;  %v1062_v62 = vand.u32 127, %v271_v35 }
  0xbf   :  { %v825_v59 = vpop.eup %824 }
  0xc0   :  { %v827_v60 = vpop.eup %826  ;;  %v133_v34 = vmul.f32 %v825_v59, %v992_v41  ;;  %vm273_vm2 = vcmp.lt.s32.totalorder %v1062_v62, 1  ;;  %vm274_vm3 = vcmp.lt.s32.totalorder %v1062_v62, 2  ;;  %vm275_vm4 = vcmp.lt.s32.totalorder %v1062_v62, 4 }
  0xc1   :  { %769 = vmatpush3.xpose.msk.msra.mxu0 %vm30_vm0, %v140_v16  ;;  %v36_v61 = vmul.f32 %v827_v60, %v1004_v47  ;;  %v278_v63 = vsel %vm273_vm2, 0.0, %v277_v40 }
  0xc2   :  { %770 = vmatprep.subr.mxu0 %v852_v46  ;;  %v279_v3 = vmin.f32 %v278_v63, 1e+30 }
  0xc5   :  { %771 = vmatpush3.xpose.msk.msra.mxu0 %vm30_vm0, %v139_v17 }
  0xc6   :  { %772 = vmatprep.subr.mxu0 %v852_v46 }
  0xc9   :  { %773 = vmatpush3.xpose.msk.msra.mxu0 %vm30_vm0, %v138_v22 }
  0xca   :  { %774 = vmatprep.subr.mxu0 %v852_v46 }
  0xcd   :  { %775 = vmatpush3.xpose.msk.msra.mxu0 %vm30_vm0, %v137_v23 }
  0xce   :  { %776 = vmatprep.subr.mxu0 %v852_v46 }
  0xd1   :  { %777 = vmatpush3.xpose.msk.msra.mxu0 %vm30_vm0, %v136_v56 }
  0xd2   :  { %778 = vmatprep.subr.mxu0 %v852_v46 }
  0xd5   :  { %779 = vmatpush3.xpose.msk.msra.mxu0 %vm30_vm0, %v135_v57 }
  0xd6   :  { %780 = vmatprep.subr.mxu0 %v852_v46 }
  0xd9   :  { %781 = vmatpush3.xpose.msk.msra.mxu0 %vm30_vm0, %v134_v29 }
  0xda   :  { %782 = vmatprep.subr.mxu0 %v852_v46 }
  0xdd   :  { %783 = vmatpush3.xpose.msk.msra.mxu0 %vm30_vm0, %v133_v34 }
  0xe0   :  { %785 = vmatmul.mubr.msk.f32.vlgmr.msra.gmra.mxu0 %vm30_vm0, %v36_v61 }
 0x1a0   :  { %v266_v4 = vpop.f32.mrf.mxu0 }
 0x1a1   :  { %v1067_v41 = vsub.f32 1.0, %v266_v4 }
 0x1a2   :  { %v786_v46 = vpop.f32.mrf.mxu0 }
 0x1a3   :  { %281 = vrot.lane.b32.xlu1 %v1067_v41, %s855_s0  ;;  %v280_v47 = vadd.f32 %v279_v3, %v1067_v41  ;;  %v313_v27 = vrot.slane %v1067_v41, 1  ;;  %v370_v58 = vrot.slane %v1067_v41, 2 }
 0x1a5   :  { %284 = vrot.lane.b32.xlu0 %v280_v47, %s855_s0 }
 0x215   :  { %v282_v10 = vpop.permute.xlu1 %281 }
 0x216   :  { %v283_v13 = vsel %vm273_vm2, 0.0, %v282_v10 }
 0x217   :  { %v285_v5 = vpop.permute.xlu0 %284  ;;  %v289_v14 = vadd.f32 %v283_v13, %v1067_v41 }
 0x218   :  { %v286_v7 = vsel %vm273_vm2, 1e+30, %v285_v5 }
 0x219   :  { %v287_v11 = vadd.f32 %v286_v7, %v1067_v41 }
 0x21b   :  { %v288_v12 = vmin.f32 %v280_v47, %v287_v11 }
 0x21d   :  { %293 = vrot.lane.b32.xlu1 %v288_v12, %s856_s1 }
 0x221   :  { %290 = vrot.lane.b32.xlu1 %v289_v14, %s856_s1 }
 0x28f   :  { %v294_v15 = vpop.permute.xlu1 %293 }
 0x290   :  { %v295_v18 = vsel %vm274_vm3, 1e+30, %v294_v15 }
 0x291   :  { %v296_v19 = vadd.f32 %v295_v18, %v289_v14 }
 0x293   :  { %v297_v0 = vmin.f32 %v288_v12, %v296_v19  ;;  %v291_v20 = vpop.permute.xlu1 %290 }
 0x294   :  { %v292_v21 = vsel %vm274_vm3, 0.0, %v291_v20 }
 0x295   :  { %299 = vrot.lane.b32.xlu0 %v297_v0, %s857_s15  ;;  %v298_v24 = vadd.f32 %v292_v21, %v289_v14 }
 0x307   :  { %v300_v1 = vpop.permute.xlu0 %299 }
 0x308   :  { %v301_v2 = vsel %vm275_vm4, 1e+30, %v300_v1 }
 0x309   :  { %v302_v25 = vadd.f32 %v301_v2, %v298_v24 }
 0x30b   :  { %v303_v26 = vmin.f32 %v297_v0, %v302_v25 }
 0x30d   :  { %304 = vrot.lane.b32.xlu1 %v303_v26, %s855_s0 }
 0x311   :  { %315 = vrot.lane.b32.xlu1 %v313_v27, %s855_s0 }
 0x37f   :  { %v305_v6 = vpop.permute.xlu1 %304 }
 0x380   :  { %v306_v30 = vsel %vm273_vm2, 1e+30, %v305_v6  ;;  %v427_v6 = vrot.slane %v1067_v41, 3 }
 0x381   :  { %v307_v31 = vmin.f32 %v303_v26, %v306_v30 }
 0x383   :  { %v309_v32 = vrot.slane %v307_v31, 7  ;;  %v316_v8 = vpop.permute.xlu1 %315 }
 0x384   :  { %v317_v33 = vsel %vm273_vm2, 0.0, %v316_v8 }
 0x385   :  { %v311_v36 = vadd.f32 %v309_v32, %v1067_v41  ;;  %v329_v37 = vadd.f32 %v317_v33, %v313_v27 }
 0x387   :  { %330 = vrot.lane.b32.xlu1 %v329_v37, %s856_s1  ;;  %v319_v9 = vrot.slane %v311_v36, 1 }
 0x389   :  { %321 = vrot.lane.b32.xlu0 %v319_v9, %s855_s0 }
 0x3f9   :  { %v331_v51 = vpop.permute.xlu1 %330 }
 0x3fa   :  { %v332_v52 = vsel %vm274_vm3, 0.0, %v331_v51 }
 0x3fb   :  { %v322_v38 = vpop.permute.xlu0 %321  ;;  %v344_v53 = vadd.f32 %v332_v52, %v329_v37 }
 0x3fc   :  { %v323_v39 = vsel %vm273_vm2, 1e+30, %v322_v38 }
 0x3fd   :  { %v324_v42 = vadd.f32 %v323_v39, %v313_v27 }
 0x3ff   :  { %v326_v16 = vrot.slane %v324_v42, 7 }
 0x401   :  { %v328_v43 = vmin.f32 %v311_v36, %v326_v16 }
 0x403   :  { %v334_v44 = vrot.slane %v328_v43, 1 }
 0x405   :  { %336 = vrot.lane.b32.xlu0 %v334_v44, %s856_s1 }
 0x477   :  { %v337_v45 = vpop.permute.xlu0 %336 }
 0x478   :  { %v338_v17 = vsel %vm274_vm3, 1e+30, %v337_v45 }
 0x479   :  { %v339_v48 = vadd.f32 %v338_v17, %v329_v37 }
 0x47b   :  { %v341_v49 = vrot.slane %v339_v48, 7 }
 0x47d   :  { %v343_v50 = vmin.f32 %v328_v43, %v341_v49 }
 0x47f   :  { %v346_v22 = vrot.slane %v343_v50, 1 }
 0x481   :  { %348 = vrot.lane.b32.xlu0 %v346_v22, %s857_s15 }
 0x4f3   :  { %v349_v54 = vpop.permute.xlu0 %348 }
 0x4f4   :  { %v350_v23 = vsel %vm275_vm4, 1e+30, %v349_v54 }
 0x4f5   :  { %v351_v55 = vadd.f32 %v350_v23, %v344_v53 }
 0x4f7   :  { %v353_v56 = vrot.slane %v351_v55, 7 }
 0x4f9   :  { %v355_v28 = vmin.f32 %v343_v50, %v353_v56 }
 0x4fb   :  { %v357_v57 = vrot.slane %v355_v28, 1 }
 0x4fd   :  { %359 = vrot.lane.b32.xlu1 %v357_v57, %s855_s0 }
 0x501   :  { %372 = vrot.lane.b32.xlu1 %v370_v58, %s855_s0 }
 0x56f   :  { %v360_v29 = vpop.permute.xlu1 %359 }
 0x570   :  { %v361_v59 = vsel %vm273_vm2, 1e+30, %v360_v29 }
 0x571   :  { %v363_v60 = vrot.slane %v361_v59, 7  ;;  %v484_v59 = vrot.slane %v1067_v41, 4 }
 0x573   :  { %v365_v34 = vmin.f32 %v355_v28, %v363_v60  ;;  %v373_v61 = vpop.permute.xlu1 %372 }
 0x574   :  { %v374_v35 = vsel %vm273_vm2, 0.0, %v373_v61 }
 0x575   :  { %v367_v40 = vrot.slane %v365_v34, 7  ;;  %v386_v63 = vadd.f32 %v374_v35, %v370_v58 }
 0x577   :  { %v369_v3 = vadd.f32 %v367_v40, %v1067_v41  ;;  %387 = vrot.lane.b32.xlu1 %v386_v63, %s856_s1 }
 0x579   :  { %v376_v4 = vrot.slane %v369_v3, 2 }
 0x57b   :  { %378 = vrot.lane.b32.xlu0 %v376_v4, %s855_s0 }
 0x5e9   :  { %v388_v0 = vpop.permute.xlu1 %387 }
 0x5ea   :  { %v389_v20 = vsel %vm274_vm3, 0.0, %v388_v0 }
 0x5eb   :  { %v401_v21 = vadd.f32 %v389_v20, %v386_v63 }
 0x5ed   :  { %v379_v46 = vpop.permute.xlu0 %378 }
 0x5ee   :  { %v380_v47 = vsel %vm273_vm2, 1e+30, %v379_v46 }
 0x5ef   :  { %v381_v5 = vadd.f32 %v380_v47, %v370_v58 }
 0x5f1   :  { %v383_v7 = vrot.slane %v381_v5, 6 }
 0x5f3   :  { %v385_v10 = vmin.f32 %v369_v3, %v383_v7 }
 0x5f5   :  { %v391_v11 = vrot.slane %v385_v10, 2 }
 0x5f7   :  { %393 = vrot.lane.b32.xlu0 %v391_v11, %s856_s1 }
 0x669   :  { %v394_v12 = vpop.permute.xlu0 %393 }
 0x66a   :  { %v395_v13 = vsel %vm274_vm3, 1e+30, %v394_v12 }
 0x66b   :  { %v396_v14 = vadd.f32 %v395_v13, %v386_v63 }
 0x66d   :  { %v398_v15 = vrot.slane %v396_v14, 6 }
 0x66f   :  { %v400_v18 = vmin.f32 %v385_v10, %v398_v15 }
 0x671   :  { %v403_v19 = vrot.slane %v400_v18, 2 }
 0x673   :  { %405 = vrot.lane.b32.xlu0 %v403_v19, %s857_s15 }
 0x6e5   :  { %v406_v24 = vpop.permute.xlu0 %405 }
 0x6e6   :  { %v407_v1 = vsel %vm275_vm4, 1e+30, %v406_v24 }
 0x6e7   :  { %v408_v2 = vadd.f32 %v407_v1, %v401_v21 }
 0x6e9   :  { %v410_v25 = vrot.slane %v408_v2, 6 }
 0x6eb   :  { %v412_v26 = vmin.f32 %v400_v18, %v410_v25 }
 0x6ed   :  { %v414_v27 = vrot.slane %v412_v26, 2 }
 0x6ef   :  { %416 = vrot.lane.b32.xlu1 %v414_v27, %s855_s0 }
 0x6f3   :  { %429 = vrot.lane.b32.xlu1 %v427_v6, %s855_s0 }
 0x761   :  { %v417_v30 = vpop.permute.xlu1 %416 }
 0x762   :  { %v418_v31 = vsel %vm273_vm2, 1e+30, %v417_v30 }
 0x763   :  { %v420_v32 = vrot.slane %v418_v31, 6  ;;  %v541_v31 = vrot.slane %v1067_v41, 5 }
 0x765   :  { %v422_v8 = vmin.f32 %v412_v26, %v420_v32  ;;  %v430_v33 = vpop.permute.xlu1 %429 }
 0x766   :  { %v431_v36 = vsel %vm273_vm2, 0.0, %v430_v33 }
 0x767   :  { %v424_v37 = vrot.slane %v422_v8, 7  ;;  %v443_v9 = vadd.f32 %v431_v36, %v427_v6 }
 0x769   :  { %v426_v38 = vadd.f32 %v424_v37, %v1067_v41  ;;  %444 = vrot.lane.b32.xlu1 %v443_v9, %s856_s1 }
 0x76b   :  { %v433_v39 = vrot.slane %v426_v38, 3 }
 0x76d   :  { %435 = vrot.lane.b32.xlu0 %v433_v39, %s855_s0 }
 0x7db   :  { %v445_v53 = vpop.permute.xlu1 %444 }
 0x7dc   :  { %v446_v54 = vsel %vm274_vm3, 0.0, %v445_v53 }
 0x7dd   :  { %v458_v23 = vadd.f32 %v446_v54, %v443_v9 }
 0x7df   :  { %v436_v42 = vpop.permute.xlu0 %435 }
 0x7e0   :  { %v437_v16 = vsel %vm273_vm2, 1e+30, %v436_v42 }
 0x7e1   :  { %v438_v43 = vadd.f32 %v437_v16, %v427_v6 }
 0x7e3   :  { %v440_v44 = vrot.slane %v438_v43, 5 }
 0x7e5   :  { %v442_v45 = vmin.f32 %v426_v38, %v440_v44 }
 0x7e7   :  { %v448_v17 = vrot.slane %v442_v45, 3 }
 0x7e9   :  { %450 = vrot.lane.b32.xlu0 %v448_v17, %s856_s1 }
 0x85b   :  { %v451_v48 = vpop.permute.xlu0 %450 }
 0x85c   :  { %v452_v49 = vsel %vm274_vm3, 1e+30, %v451_v48 }
 0x85d   :  { %v453_v50 = vadd.f32 %v452_v49, %v443_v9 }
 0x85f   :  { %v455_v22 = vrot.slane %v453_v50, 5 }
 0x861   :  { %v457_v51 = vmin.f32 %v442_v45, %v455_v22 }
 0x863   :  { %v460_v52 = vrot.slane %v457_v51, 3 }
 0x865   :  { %462 = vrot.lane.b32.xlu0 %v460_v52, %s857_s15 }
 0x8d7   :  { %v463_v55 = vpop.permute.xlu0 %462 }
 0x8d8   :  { %v464_v56 = vsel %vm275_vm4, 1e+30, %v463_v55 }
 0x8d9   :  { %v465_v28 = vadd.f32 %v464_v56, %v458_v23 }
 0x8db   :  { %v467_v57 = vrot.slane %v465_v28, 5 }
 0x8dd   :  { %v469_v58 = vmin.f32 %v457_v51, %v467_v57 }
 0x8df   :  { %v471_v29 = vrot.slane %v469_v58, 3 }
 0x8e1   :  { %473 = vrot.lane.b32.xlu1 %v471_v29, %s855_s0 }
 0x8e5   :  { %486 = vrot.lane.b32.xlu1 %v484_v59, %s855_s0 }
 0x953   :  { %v474_v60 = vpop.permute.xlu1 %473 }
 0x954   :  { %v475_v34 = vsel %vm273_vm2, 1e+30, %v474_v60 }
 0x955   :  { %v477_v61 = vrot.slane %v475_v34, 5  ;;  %v598_v34 = vrot.slane %v1067_v41, 6 }
 0x957   :  { %v479_v35 = vmin.f32 %v469_v58, %v477_v61  ;;  %v487_v40 = vpop.permute.xlu1 %486 }
 0x958   :  { %v488_v63 = vsel %vm273_vm2, 0.0, %v487_v40 }
 0x959   :  { %v481_v3 = vrot.slane %v479_v35, 7  ;;  %v500_v4 = vadd.f32 %v488_v63, %v484_v59 }
 0x95b   :  { %v483_v46 = vadd.f32 %v481_v3, %v1067_v41  ;;  %501 = vrot.lane.b32.xlu1 %v500_v4, %s856_s1 }
 0x95d   :  { %v490_v47 = vrot.slane %v483_v46, 4 }
 0x95f   :  { %492 = vrot.lane.b32.xlu0 %v490_v47, %s855_s0 }
 0x9cd   :  { %v502_v21 = vpop.permute.xlu1 %501 }
 0x9ce   :  { %v503_v24 = vsel %vm274_vm3, 0.0, %v502_v21 }
 0x9cf   :  { %v515_v1 = vadd.f32 %v503_v24, %v500_v4 }
 0x9d1   :  { %v493_v5 = vpop.permute.xlu0 %492 }
 0x9d2   :  { %v494_v7 = vsel %vm273_vm2, 1e+30, %v493_v5 }
 0x9d3   :  { %v495_v10 = vadd.f32 %v494_v7, %v484_v59 }
 0x9d5   :  { %v497_v11 = vrot.slane %v495_v10, 4 }
 0x9d7   :  { %v499_v12 = vmin.f32 %v483_v46, %v497_v11 }
 0x9d9   :  { %v505_v13 = vrot.slane %v499_v12, 4 }
 0x9db   :  { %507 = vrot.lane.b32.xlu0 %v505_v13, %s856_s1 }
 0xa4d   :  { %v508_v14 = vpop.permute.xlu0 %507 }
 0xa4e   :  { %v509_v15 = vsel %vm274_vm3, 1e+30, %v508_v14 }
 0xa4f   :  { %v510_v18 = vadd.f32 %v509_v15, %v500_v4 }
 0xa51   :  { %v512_v19 = vrot.slane %v510_v18, 4 }
 0xa53   :  { %v514_v0 = vmin.f32 %v499_v12, %v512_v19 }
 0xa55   :  { %v517_v20 = vrot.slane %v514_v0, 4 }
 0xa57   :  { %519 = vrot.lane.b32.xlu0 %v517_v20, %s857_s15 }
 0xac9   :  { %v520_v2 = vpop.permute.xlu0 %519 }
 0xaca   :  { %v521_v25 = vsel %vm275_vm4, 1e+30, %v520_v2 }
 0xacb   :  { %v522_v26 = vadd.f32 %v521_v25, %v515_v1 }
 0xacd   :  { %v524_v27 = vrot.slane %v522_v26, 4 }
 0xacf   :  { %v526_v6 = vmin.f32 %v514_v0, %v524_v27 }
 0xad1   :  { %v528_v30 = vrot.slane %v526_v6, 4 }
 0xad3   :  { %530 = vrot.lane.b32.xlu1 %v528_v30, %s855_s0 }
 0xad7   :  { %543 = vrot.lane.b32.xlu1 %v541_v31, %s855_s0 }
 0xb45   :  { %v531_v32 = vpop.permute.xlu1 %530 }
 0xb46   :  { %v532_v8 = vsel %vm273_vm2, 1e+30, %v531_v32 }
 0xb47   :  { %v534_v33 = vrot.slane %v532_v8, 4  ;;  %v655_v8 = vrot.slane %v1067_v41, 7 }
 0xb49   :  { %v536_v36 = vmin.f32 %v526_v6, %v534_v33  ;;  %v544_v37 = vpop.permute.xlu1 %543 }
 0xb4a   :  { %v545_v9 = vsel %vm273_vm2, 0.0, %v544_v37 }
 0xb4b   :  { %v538_v38 = vrot.slane %v536_v36, 7  ;;  %v557_v39 = vadd.f32 %v545_v9, %v541_v31 }
 0xb4d   :  { %v540_v42 = vadd.f32 %v538_v38, %v1067_v41  ;;  %558 = vrot.lane.b32.xlu1 %v557_v39, %s856_s1 }
 0xb4f   :  { %v547_v16 = vrot.slane %v540_v42, 5 }
 0xb51   :  { %549 = vrot.lane.b32.xlu0 %v547_v16, %s855_s0 }
 0xbbf   :  { %v559_v23 = vpop.permute.xlu1 %558 }
 0xbc0   :  { %v560_v55 = vsel %vm274_vm3, 0.0, %v559_v23 }
 0xbc1   :  { %v572_v56 = vadd.f32 %v560_v55, %v557_v39 }
 0xbc3   :  { %v550_v43 = vpop.permute.xlu0 %549 }
 0xbc4   :  { %v551_v44 = vsel %vm273_vm2, 1e+30, %v550_v43 }
 0xbc5   :  { %v552_v45 = vadd.f32 %v551_v44, %v541_v31 }
 0xbc7   :  { %v554_v17 = vrot.slane %v552_v45, 3 }
 0xbc9   :  { %v556_v48 = vmin.f32 %v540_v42, %v554_v17 }
 0xbcb   :  { %v562_v49 = vrot.slane %v556_v48, 5 }
 0xbcd   :  { %564 = vrot.lane.b32.xlu0 %v562_v49, %s856_s1 }
 0xc3f   :  { %v565_v50 = vpop.permute.xlu0 %564 }
 0xc40   :  { %v566_v22 = vsel %vm274_vm3, 1e+30, %v565_v50 }
 0xc41   :  { %v567_v51 = vadd.f32 %v566_v22, %v557_v39 }
 0xc43   :  { %v569_v52 = vrot.slane %v567_v51, 3 }
 0xc45   :  { %v571_v53 = vmin.f32 %v556_v48, %v569_v52 }
 0xc47   :  { %v574_v54 = vrot.slane %v571_v53, 5 }
 0xc49   :  { %576 = vrot.lane.b32.xlu0 %v574_v54, %s857_s15 }
 0xcbb   :  { %v577_v28 = vpop.permute.xlu0 %576 }
 0xcbc   :  { %v578_v57 = vsel %vm275_vm4, 1e+30, %v577_v28 }
 0xcbd   :  { %v579_v58 = vadd.f32 %v578_v57, %v572_v56 }
 0xcbf   :  { %v581_v29 = vrot.slane %v579_v58, 3 }
 0xcc1   :  { %v583_v59 = vmin.f32 %v571_v53, %v581_v29 }
 0xcc3   :  { %v585_v60 = vrot.slane %v583_v59, 5 }
 0xcc5   :  { %587 = vrot.lane.b32.xlu1 %v585_v60, %s855_s0 }
 0xcc9   :  { %600 = vrot.lane.b32.xlu1 %v598_v34, %s855_s0 }
 0xd37   :  { %v588_v61 = vpop.permute.xlu1 %587 }
 0xd38   :  { %v589_v35 = vsel %vm273_vm2, 1e+30, %v588_v61 }
 0xd39   :  { %v591_v40 = vrot.slane %v589_v35, 3 }
 0xd3b   :  { %v593_v63 = vmin.f32 %v583_v59, %v591_v40  ;;  %v601_v3 = vpop.permute.xlu1 %600 }
 0xd3c   :  { %v602_v4 = vsel %vm273_vm2, 0.0, %v601_v3 }
 0xd3d   :  { %v595_v46 = vrot.slane %v593_v63, 7  ;;  %v614_v47 = vadd.f32 %v602_v4, %v598_v34 }
 0xd3f   :  { %v597_v5 = vadd.f32 %v595_v46, %v1067_v41  ;;  %615 = vrot.lane.b32.xlu1 %v614_v47, %s856_s1 }
 0xd41   :  { %v604_v7 = vrot.slane %v597_v5, 6 }
 0xd43   :  { %606 = vrot.lane.b32.xlu0 %v604_v7, %s855_s0 }
 0xdb1   :  { %v616_v1 = vpop.permute.xlu1 %615 }
 0xdb2   :  { %v617_v2 = vsel %vm274_vm3, 0.0, %v616_v1 }
 0xdb3   :  { %v629_v25 = vadd.f32 %v617_v2, %v614_v47 }
 0xdb5   :  { %v607_v10 = vpop.permute.xlu0 %606 }
 0xdb6   :  { %v608_v11 = vsel %vm273_vm2, 1e+30, %v607_v10 }
 0xdb7   :  { %v609_v12 = vadd.f32 %v608_v11, %v598_v34 }
 0xdb9   :  { %v611_v13 = vrot.slane %v609_v12, 2 }
 0xdbb   :  { %v613_v14 = vmin.f32 %v597_v5, %v611_v13 }
 0xdbd   :  { %v619_v15 = vrot.slane %v613_v14, 6 }
 0xdbf   :  { %621 = vrot.lane.b32.xlu0 %v619_v15, %s856_s1 }
 0xe31   :  { %v622_v18 = vpop.permute.xlu0 %621 }
 0xe32   :  { %v623_v19 = vsel %vm274_vm3, 1e+30, %v622_v18 }
 0xe33   :  { %v624_v0 = vadd.f32 %v623_v19, %v614_v47 }
 0xe35   :  { %v626_v20 = vrot.slane %v624_v0, 2 }
 0xe37   :  { %v628_v21 = vmin.f32 %v613_v14, %v626_v20 }
 0xe39   :  { %v631_v24 = vrot.slane %v628_v21, 6 }
 0xe3b   :  { %633 = vrot.lane.b32.xlu0 %v631_v24, %s857_s15 }
 0xead   :  { %v634_v26 = vpop.permute.xlu0 %633 }
 0xeae   :  { %v635_v27 = vsel %vm275_vm4, 1e+30, %v634_v26 }
 0xeaf   :  { %v636_v6 = vadd.f32 %v635_v27, %v629_v25 }
 0xeb1   :  { %v638_v30 = vrot.slane %v636_v6, 2 }
 0xeb3   :  { %v640_v31 = vmin.f32 %v628_v21, %v638_v30 }
 0xeb5   :  { %v642_v32 = vrot.slane %v640_v31, 6 }
 0xeb7   :  { %644 = vrot.lane.b32.xlu1 %v642_v32, %s855_s0 }
 0xebb   :  { %657 = vrot.lane.b32.xlu1 %v655_v8, %s855_s0 }
 0xf29   :  { %v645_v33 = vpop.permute.xlu1 %644 }
 0xf2a   :  { %v646_v36 = vsel %vm273_vm2, 1e+30, %v645_v33 }
 0xf2b   :  { %v648_v37 = vrot.slane %v646_v36, 2 }
 0xf2d   :  { %v650_v9 = vmin.f32 %v640_v31, %v648_v37  ;;  %v658_v38 = vpop.permute.xlu1 %657 }
 0xf2e   :  { %v659_v39 = vsel %vm273_vm2, 0.0, %v658_v38 }
 0xf2f   :  { %v652_v42 = vrot.slane %v650_v9, 7  ;;  %v671_v16 = vadd.f32 %v659_v39, %v655_v8 }
 0xf31   :  { %v654_v43 = vadd.f32 %v652_v42, %v1067_v41  ;;  %672 = vrot.lane.b32.xlu1 %v671_v16, %s856_s1 }
 0xf33   :  { %v661_v44 = vrot.slane %v654_v43, 7 }
 0xf35   :  { %663 = vrot.lane.b32.xlu0 %v661_v44, %s855_s0 }
 0xfa3   :  { %v673_v55 = vpop.permute.xlu1 %672 }
 0xfa4   :  { %v674_v56 = vsel %vm274_vm3, 0.0, %v673_v55 }
 0xfa5   :  { %v686_v28 = vadd.f32 %v674_v56, %v671_v16 }
 0xfa7   :  { %v664_v45 = vpop.permute.xlu0 %663 }
 0xfa8   :  { %v665_v17 = vsel %vm273_vm2, 1e+30, %v664_v45 }
 0xfa9   :  { %v666_v48 = vadd.f32 %v665_v17, %v655_v8 }
 0xfab   :  { %v668_v49 = vrot.slane %v666_v48, 1 }
 0xfad   :  { %v670_v50 = vmin.f32 %v654_v43, %v668_v49 }
 0xfaf   :  { %v676_v22 = vrot.slane %v670_v50, 7 }
 0xfb1   :  { %678 = vrot.lane.b32.xlu0 %v676_v22, %s856_s1 }
0x1023   :  { %v679_v51 = vpop.permute.xlu0 %678 }
0x1024   :  { %v680_v52 = vsel %vm274_vm3, 1e+30, %v679_v51 }
0x1025   :  { %v681_v41 = vadd.f32 %v680_v52, %v671_v16 }
0x1027   :  { %v683_v53 = vrot.slane %v681_v41, 1 }
0x1029   :  { %v685_v54 = vmin.f32 %v670_v50, %v683_v53 }
0x102b   :  { %v688_v23 = vrot.slane %v685_v54, 7 }
0x102d   :  { %690 = vrot.lane.b32.xlu0 %v688_v23, %s857_s15 }
0x109f   :  { %v691_v57 = vpop.permute.xlu0 %690 }
0x10a0   :  { %v692_v58 = vsel %vm275_vm4, 1e+30, %v691_v57 }
0x10a1   :  { %v693_v29 = vadd.f32 %v692_v58, %v686_v28 }
0x10a3   :  { %v695_v59 = vrot.slane %v693_v29, 1 }
0x10a5   :  { %v697_v60 = vmin.f32 %v685_v54, %v695_v59 }
0x10a7   :  { %v698_v34 = vadd.f32 1.0, %v697_v60 }
0x10a9   :  { %828 = vrcp.f32 %v698_v34 }
0x10b6   :  { %v829_v61 = vpop.eup %828 }
0x10b7   :  { %v700_v35 = vmul.f32 %v829_v61, %v698_v34 }
0x10b9   :  { %v701_v40 = vsub.f32 2.0, %v700_v35 }
0x10bb   :  { %v702_v63 = vmul.f32 %v829_v61, %v701_v40 }
0x10bd   :  { %703 = vst [vmem:[#allocation2 - $0x7] sm:$0x80] %v702_v63 }
0x10be   :  { %841 = shalt.err (!%p838_p4)
}
0x10bf   :  { %713 = dma.vmem_to_hbm [thread:$0]  %s711_s17, 16, %s1235_s2, [#allocation3]  }
0x10c0   :  { %850 = dma.done.wait [#allocation3], 16  }
0x10c1   :  { %851 = vsyncadd [#allocation3], 4294967280 }
0x10c2   :  { %717 = vsyncpa [#allocation3], 1 }

</bundles_post_ra>
